<compile_context>
chip_gen: v7x
topology: tpu7x:2x2x1
jax: 0.10.0
libtpu: 0.0.40
codegen_flags: <defaults>
</compile_context>

<pallas_src>
import jax
import jax.numpy as jnp
from jax.experimental import pallas as pl
from jax.experimental.pallas import tpu as pltpu

_MIB = 1024 * 1024


# ---------------------------------------------------------------------------
# Pass 1: spatial sum per (N, C).  x tile is (nb, C, TP): C on sublanes, P on
# lanes.  The output block index is constant along the inner (reduction) grid
# axis, so the (nb, C, 1) f32 accumulator stays resident in VMEM across tiles.
# ---------------------------------------------------------------------------
def _pool_sum_kernel(x_ref, sum_ref):
    part = jnp.sum(x_ref[...].astype(jnp.float32), axis=-1, keepdims=True)  # (nb, C, 1)

    @pl.when(pl.program_id(2) == 0)
    def _():
        sum_ref[...] = part

    @pl.when(pl.program_id(2) != 0)
    def _():
        sum_ref[...] += part


# ---------------------------------------------------------------------------
# Pass 2: fused sSE + combine on a (nb, C, TP) tile.
#   sSE  = sigmoid(sum_c(w_c * x) + bs)        (nb, 1, TP), f32 math
#   gate = cSE (nb,C,1) + sSE (nb,1,TP)        broadcast add in gate dtype
#   out  = x * gate                            single VPU multiply on the tile
# ---------------------------------------------------------------------------
def _scse_apply_kernel(x_ref, cse_ref, ws_ref, bs_ref, o_ref):
    x = x_ref[...]                                      # (nb, C, TP) native dtype
    w = ws_ref[...].astype(x.dtype)                     # (1, C, 1) per-channel sSE weight
    sse_logit = jnp.sum((x * w).astype(jnp.float32), axis=1, keepdims=True) + bs_ref[0]
    sse = jax.nn.sigmoid(sse_logit)                     # (nb, 1, TP) f32 (EUP)
    gate = cse_ref[...] + sse.astype(cse_ref.dtype)     # (nb, C, TP) in gate dtype
    o_ref[...] = (x * gate).astype(o_ref.dtype)


# ---------------------------------------------------------------------------
# Sizing helpers (generation-aware).
# ---------------------------------------------------------------------------
def _vmem_capacity_bytes():
    try:
        return int(pltpu.get_tpu_info().vmem_capacity_bytes)
    except Exception:
        return 64 * _MIB          # conservative (v7x-sized) fallback


def _choose_spatial_tile(Pp, C, itemsize, budget_bytes):
    """Largest lane-dense spatial tile TP (multiple of 128) dividing Pp with a
    (C, TP) buffer under budget_bytes.  Pp is already a multiple of 128."""
    best = 128
    n = Pp // 128
    for d in range(1, n + 1):
        if n % d == 0:
            tp = 128 * d
            if C * tp * itemsize <= budget_bytes:
                best = tp
    return min(best, Pp)


def _choose_batch_block(N, per_item_bytes, budget_bytes, target_bytes=4 * _MIB):
    """Smallest divisor of N whose block reaches ~target_bytes per grid step
    (amortizes the ~0.35 us step overhead), never exceeding budget_bytes."""
    best = 1
    for d in range(1, N + 1):
        if N % d != 0:
            continue
        if d * per_item_bytes > budget_bytes:
            break
        best = d
        if d * per_item_bytes >= target_bytes:
            break
    return best


def _gate_dtype(x_dtype):
    """bf16 gate math only where the VPU natively supports it (not v5e)."""
    if jnp.dtype(x_dtype) != jnp.dtype(jnp.bfloat16):
        return jnp.float32
    try:
        kind = jax.devices()[0].device_kind.lower()
    except Exception:
        kind = ""
    if "v5 lite" in kind or "v5e" in kind or "v5litepod" in kind:
        return jnp.float32
    return jnp.bfloat16


def _x_spec_with_buffering(block_shape, index_map, want_extra_buffer):
    """Pass-1 input spec.  Pass-1 VMEM is nearly empty (no big output), so a
    third input buffer is free insurance against exposed DMA-start latency."""
    if want_extra_buffer and hasattr(pl, "Buffered"):
        try:
            return pl.BlockSpec(block_shape, index_map, pipeline_mode=pl.Buffered(3))
        except TypeError:
            pass
    return pl.BlockSpec(block_shape, index_map)


# ---------------------------------------------------------------------------
# SCSE attention wrapper.
# ---------------------------------------------------------------------------
def scse_attention(x_nchw, params):
    """SCSE attention. x_nchw: (N, C, H, W); params from init_scse_params."""
    w1, b1, w2, b2, ws_t, bs = params
    N, C, H, W = x_nchw.shape
    P = H * W
    itemsize = jnp.dtype(x_nchw.dtype).itemsize

    # NCHW -> (N, C, P): free reshape — no transpose, no extra HBM traffic.
    x = x_nchw.reshape(N, C, P)

    # Pad spatial axis to a multiple of 128.  Pad lanes are zero, so they
    # contribute nothing to the pooled sum and produce zeros (discarded) in
    # the gated output.
    Pp = ((P + 127) // 128) * 128
    if Pp != P:
        x = jnp.pad(x, ((0, 0), (0, 0), (0, Pp - P)))

    # ---- generation-aware VMEM budgets ----
    vmem_cap = _vmem_capacity_bytes()                     # 128 MiB v5e/v6e, 64 MiB v7x
    vmem_limit = min(96 * _MIB, (vmem_cap * 3) // 4)      # 96 MiB / 48 MiB
    budget2 = max(_MIB, min(16 * _MIB, vmem_limit // 8))  # pass 2: 2x in + 2x out buffers
    budget1 = max(budget2, min(2 * budget2, (vmem_limit * 4 // 5) // 3))  # pass 1: 3 in buffers

    # ---- Pass 1: spatial sum -> (n_chunks, N, C, 1) f32 partial sums ----
    tp1 = _choose_spatial_tile(Pp, C, itemsize, budget1)
    nb1 = _choose_batch_block(N, C * tp1 * itemsize, budget1)
    grid_b1 = N // nb1
    spatial_tiles1 = Pp // tp1
    # When batch parallelism is gone (small N), split the spatial reduction
    # into two "parallel" chunks so both TensorCores (v7x) drive pass-1 DMA.
    n_chunks = 2 if (grid_b1 < 2 and spatial_tiles1 >= 2 and spatial_tiles1 % 2 == 0) else 1
    steps1 = spatial_tiles1 // n_chunks

    x1_spec = _x_spec_with_buffering(
        (nb1, C, tp1),
        lambda b, c, k: (b, 0, c * steps1 + k),
        want_extra_buffer=(grid_b1 * spatial_tiles1 >= 4),
    )

    partials = pl.pallas_call(
        _pool_sum_kernel,
        out_shape=jax.ShapeDtypeStruct((n_chunks, N, C, 1), jnp.float32),
        grid=(grid_b1, n_chunks, steps1),
        in_specs=[x1_spec],
        out_specs=pl.BlockSpec((None, nb1, C, 1), lambda b, c, k: (c, b, 0, 0)),
        compiler_params=pltpu.CompilerParams(
            dimension_semantics=("parallel", "parallel", "arbitrary"),
            vmem_limit_bytes=vmem_limit),
    )(x)

    # ---- cSE gate: tiny per-(N, C) MLP in plain JAX (O(N*C) work, f32) ----
    pooled = partials[..., 0].sum(axis=0) / float(P)                      # (N, C) mean
    h = jnp.maximum(pooled @ w1.astype(jnp.float32) + b1.astype(jnp.float32), 0.0)
    cse = jax.nn.sigmoid(h @ w2.astype(jnp.float32) + b2.astype(jnp.float32))
    gate_dtype = _gate_dtype(x.dtype)
    cse = cse[:, :, None].astype(gate_dtype)                              # (N, C, 1)

    # ---- Pass 2: fused sSE + combine, tiled, lane-dense, both axes parallel ----
    tp2 = _choose_spatial_tile(Pp, C, itemsize, budget2)
    nb2 = _choose_batch_block(N, C * tp2 * itemsize, budget2)
    ws_col = ws_t.reshape(1, C, 1)                                        # per-channel weight column
    bs32 = bs.astype(jnp.float32)                                         # sSE bias scalar (SMEM)

    out = pl.pallas_call(
        _scse_apply_kernel,
        out_shape=jax.ShapeDtypeStruct((N, C, Pp), x.dtype),
        grid=(N // nb2, Pp // tp2),
        in_specs=[
            pl.BlockSpec((nb2, C, tp2), lambda b, t: (b, 0, t)),   # x tile
            pl.BlockSpec((nb2, C, 1), lambda b, t: (b, 0, 0)),     # cSE gate (resident)
            pl.BlockSpec((1, C, 1), lambda b, t: (0, 0, 0)),       # sSE weights (resident)
            pl.BlockSpec(memory_space=pltpu.MemorySpace.SMEM),     # sSE bias scalar
        ],
        out_specs=pl.BlockSpec((nb2, C, tp2), lambda b, t: (b, 0, t)),
        compiler_params=pltpu.CompilerParams(
            dimension_semantics=("parallel", "parallel"),
            vmem_limit_bytes=vmem_limit),
    )(x, cse, ws_col, bs32)

    if Pp != P:
        out = out[:, :, :P]
    return out.reshape(N, C, H, W)


def attention(name, x, params=None):
    """Mirrors the PyTorch Attention module: name in {None, 'scse'}."""
    if name is None:
        return x                                  # nn.Identity
    elif name == "scse":
        return scse_attention(x, params)
    else:
        raise ValueError("Attention {} is not implemented".format(name))


def init_scse_params(key, in_channels, reduction=16, dtype=jnp.float32):
    """Conv2d 1x1 weights stored as matmul-friendly matrices:
       w1: (C, mid), b1: (1, mid)   cSE squeeze conv
       w2: (mid, C), b2: (1, C)     cSE excite conv
       ws_t: (1, C), bs: (1,)       sSE conv (C -> 1)
    """
    mid = max(in_channels // reduction, 1)
    k1, k2, k3, k4, k5, k6 = jax.random.split(key, 6)
    w1 = jax.random.normal(k1, (in_channels, mid), dtype) * 0.1
    b1 = jax.random.normal(k2, (1, mid), dtype) * 0.1
    w2 = jax.random.normal(k3, (mid, in_channels), dtype) * 0.1
    b2 = jax.random.normal(k4, (1, in_channels), dtype) * 0.1
    ws_t = jax.random.normal(k5, (1, in_channels), dtype) * 0.1
    bs = jax.random.normal(k6, (1,), dtype) * 0.1
    return (w1, b1, w2, b2, ws_t, bs)


def _scse_reference(x_nchw, params):
    """Plain-JAX reference for numerical check (NCHW, like PyTorch)."""
    w1, b1, w2, b2, ws_t, bs = params
    pooled = jnp.mean(x_nchw, axis=(2, 3))                            # (N, C)
    h = jnp.maximum(pooled @ w1 + b1, 0.0)
    cse = jax.nn.sigmoid(h @ w2 + b2)                                 # (N, C)
    sse = jax.nn.sigmoid(
        jnp.einsum("nchw,c->nhw", x_nchw, ws_t[0]) + bs[0])           # (N, H, W)
    return x_nchw * cse[:, :, None, None] + x_nchw * sse[:, None, :, :]


if __name__ == "__main__":
    key = jax.random.PRNGKey(0)
    kx, kp = jax.random.split(key)

    N, C, H, W = 2, 32, 16, 16          # in_channels=32, reduction=16 -> mid=2
    x = jax.random.normal(kx, (N, C, H, W), jnp.float32)
    params = init_scse_params(kp, in_channels=C, reduction=16)

    out = jax.block_until_ready(attention("scse", x, params))
    ref = _scse_reference(x, params)

    assert out.shape == x.shape and out.dtype == x.dtype
    assert jnp.allclose(out, ref, atol=1e-4, rtol=1e-4), "mismatch vs reference"

    # name=None (Identity) path
    ident = jax.block_until_ready(attention(None, x))
    assert jnp.array_equal(ident, x)

    print("KERNEL_OK")
</pallas_src>

<mosaic_0001>
module attributes {stable_mosaic.version = 11 : i64} {
  func.func @_pool_sum_kernel(%arg0: i32, %arg1: i32, %arg2: i32, %arg3: memref<2x32x256xf32, #tpu.memory_space<vmem>>, %arg4: memref<1x2x32x1xf32, #tpu.memory_space<vmem>>) attributes {dimension_semantics = [#tpu.dimension_semantics<parallel>, #tpu.dimension_semantics<parallel>, #tpu.dimension_semantics<arbitrary>], iteration_bounds = array<i64: 1, 1, 1>, scalar_prefetch = 0 : i64, scratch_operands = 0 : i64, tpu.core_type = #tpu.core_type<tc>, window_params = [{transform_indices = @transform_0, window_bounds = array<i64: 2, 32, 256>}, {transform_indices = @transform_1, window_bounds = array<i64: 1, 2, 32, 1>}]} {
    %c0 = arith.constant 0 : index
    %c0_0 = arith.constant 0 : index
    %c0_1 = arith.constant 0 : index
    %0 = vector.load %arg3[%c0, %c0_0, %c0_1] : memref<2x32x256xf32, #tpu.memory_space<vmem>>, vector<2x32x256xf32>
    %cst = arith.constant dense<0.000000e+00> : vector<2x32xf32>
    %1 = vector.multi_reduction <add>, %0, %cst [2] : vector<2x32x256xf32> to vector<2x32xf32>
    %2 = vector.shape_cast %1 : vector<2x32xf32> to vector<2x32x1xf32>
    %c0_i32 = arith.constant 0 : i32
    %3 = arith.cmpi eq, %arg2, %c0_i32 : i32
    %4 = arith.extui %3 : i1 to i32
    %c0_i32_2 = arith.constant 0 : i32
    %5 = arith.cmpi ne, %4, %c0_i32_2 : i32
    scf.if %5 {
      %c0_5 = arith.constant 0 : index
      %c0_6 = arith.constant 0 : index
      %c0_7 = arith.constant 0 : index
      %c0_8 = arith.constant 0 : index
      %9 = vector.load %arg4[%c0_5, %c0_6, %c0_7, %c0_8] : memref<1x2x32x1xf32, #tpu.memory_space<vmem>>, vector<1x2x32x1xf32>
      %10 = vector.shape_cast %9 : vector<1x2x32x1xf32> to vector<2x32x1xf32>
      %11 = vector.shape_cast %2 : vector<2x32x1xf32> to vector<1x2x32x1xf32>
      tpu.vector_store %arg4[%c0_5, %c0_6, %c0_7, %c0_8], %11 {strides = array<i32>} : memref<1x2x32x1xf32, #tpu.memory_space<vmem>>, vector<1x2x32x1xf32>,
    } else {
    }
    %c0_i32_3 = arith.constant 0 : i32
    %6 = arith.cmpi ne, %arg2, %c0_i32_3 : i32
    %7 = arith.extui %6 : i1 to i32
    %c0_i32_4 = arith.constant 0 : i32
    %8 = arith.cmpi ne, %7, %c0_i32_4 : i32
    scf.if %8 {
      %c0_5 = arith.constant 0 : index
      %c0_6 = arith.constant 0 : index
      %c0_7 = arith.constant 0 : index
      %c0_8 = arith.constant 0 : index
      %9 = vector.load %arg4[%c0_5, %c0_6, %c0_7, %c0_8] : memref<1x2x32x1xf32, #tpu.memory_space<vmem>>, vector<1x2x32x1xf32>
      %10 = vector.shape_cast %9 : vector<1x2x32x1xf32> to vector<2x32x1xf32>
      %11 = arith.addf %10, %2 : vector<2x32x1xf32>
      %c0_9 = arith.constant 0 : index
      %c0_10 = arith.constant 0 : index
      %c0_11 = arith.constant 0 : index
      %c0_12 = arith.constant 0 : index
      %12 = vector.load %arg4[%c0_9, %c0_10, %c0_11, %c0_12] : memref<1x2x32x1xf32, #tpu.memory_space<vmem>>, vector<1x2x32x1xf32>
      %13 = vector.shape_cast %12 : vector<1x2x32x1xf32> to vector<2x32x1xf32>
      %14 = vector.shape_cast %11 : vector<2x32x1xf32> to vector<1x2x32x1xf32>
      tpu.vector_store %arg4[%c0_9, %c0_10, %c0_11, %c0_12], %14 {strides = array<i32>} : memref<1x2x32x1xf32, #tpu.memory_space<vmem>>, vector<1x2x32x1xf32>,
    } else {
    }
    return
  }
  func.func @transform_0(%arg0: i32, %arg1: i32, %arg2: i32) -> (i32, i32, i32) {
    %c1_i32 = arith.constant 1 : i32
    %0 = arith.muli %arg1, %c1_i32 : i32
    %1 = arith.addi %0, %arg2 : i32
    %c0_i32 = arith.constant 0 : i32
    %c0_i32_0 = arith.constant 0 : i32
    return %arg0, %c0_i32, %1 : i32, i32, i32
  }
  func.func @transform_1(%arg0: i32, %arg1: i32, %arg2: i32) -> (i32, i32, i32, i32) {
    %c0_i32 = arith.constant 0 : i32
    %c0_i32_0 = arith.constant 0 : i32
    %c0_i32_1 = arith.constant 0 : i32
    return %arg1, %arg0, %c0_i32, %c0_i32_0 : i32, i32, i32, i32
  }
}

</mosaic_0001>

<bundles_post_ra>
// kernel: tpu_custom_call.1
= control target key start
LH: loop header
LB: loop body
LE: loop exit
PB: predicated region body
PF: predicated region fallthrough
CT: control target
= control target key end

     0   :  { %6 = vsyncpa [#allocation3], 0  ;;  %s142_s6 = smov [#allocation2]   ;;  %s199_s0 = inlined_call_operand.hbm [shape: f32[2,32,256], index: 0, kind: input, shape index: {}]   ;;  %s200_s1 = inlined_call_operand.vmem [shape: f32[1,2,32,1], index: 1, kind: output, shape index: {}]  }
   0x1   :  { %s16_s7 = sshll.u32 %s142_s6, 4  ;;  %s118_s10 = scalar_lea.hbm %s199_s0, 2048  ;;  %s17_s7 = int_to_ptr.vmem [resolvable:$true] %s16_s7 }
   0x2   :  { %p119_p0 = scmp.ne.s32.totalorder %s199_s0, %s118_s10  ;;  %p122_p1 = scmp.lt.u32.totalorder %s118_s10, %s199_s0 }
   0x4   :  { %p124_p2 = pnand %p122_p1, %p119_p0 }
   0x6   :  { %127 = shalt.err (!%p124_p2)
}
   0x7   :  { %s128_s15 = scalar_lea.vmem %s17_s7, 2048  ;;  %p133_p4 = scmp.lt.s32.totalorder %s17_s7, %s17_s7 }
   0x8   :  { %p129_p3 = scmp.ne.s32.totalorder %s17_s7, %s128_s15  ;;  %p134_p5 = scmp.lt.s32.totalorder %s128_s15, %s128_s15 }
   0xa   :  { %p135_p6 = por %p134_p5, %p133_p4 }
   0xc   :  { %p136_p7 = pnand %p135_p6, %p129_p3 }
   0xe   :  { %139 = shalt.err (!%p136_p7)
}
   0xf   :  { %s143_s16 = smov 256   ;;  %s144_s17 = smov 16  }
  0x10   :  { %22 = dma.hbm_to_vmem [thread:$0]  %s199_s0, 2048, %s17_s7, [#allocation3], %s143_s16, %s143_s16, %s144_s17  }
  0x11   :  { %140 = dma.done.wait [#allocation3], 2048  }
  0x12   :  { %141 = vsyncadd [#allocation3], 4294965248  ;;  %v32_v0 = vld [vmem:[#allocation2 + $0x20] sm:$0xff]  ;;  %v33_v1 = vld [vmem:[#allocation2 + $0x28] sm:$0xff]  ;;  %vm72_vm0 = vcmask 7168  }
  0x13   :  { %v28_v2 = vld [vmem:[#allocation2] sm:$0xff]  ;;  %v50_v3 = vadd.f32 %v33_v1, %v32_v0  ;;  %v29_v4 = vld [vmem:[#allocation2 + $0x8] sm:$0xff]  ;;  %v34_v5 = vld [vmem:[#allocation2 + $0x30] sm:$0xff] }
  0x14   :  { %v35_v6 = vld [vmem:[#allocation2 + $0x38] sm:$0xff]  ;;  %v44_v7 = vadd.f32 %v29_v4, %v28_v2  ;;  %v30_v8 = vld [vmem:[#allocation2 + $0x10] sm:$0xff]  ;;  %v36_v14 = vld [vmem:[#allocation2 + $0x40] sm:$0xff] }
  0x15   :  { %v31_v9 = vld [vmem:[#allocation2 + $0x18] sm:$0xff]  ;;  %51 = vadd.xlane.f32.xlu1 %v50_v3  ;;  %v53_v10 = vadd.f32 %v35_v6, %v34_v5  ;;  %v38_v12 = vld [vmem:[#allocation2 + $0x50] sm:$0xff]  ;;  %v37_v15 = vld [vmem:[#allocation2 + $0x48] sm:$0xff] }
  0x16   :  { %45 = vadd.xlane.f32.xlu0 %v44_v7  ;;  %v47_v11 = vadd.f32 %v31_v9, %v30_v8  ;;  %v39_v13 = vld [vmem:[#allocation2 + $0x58] sm:$0xff]  ;;  %v56_v17 = vadd.f32 %v37_v15, %v36_v14  ;;  %v42_v18 = vld [vmem:[#allocation2 + $0x70] sm:$0xff]  ;;  %v40_v20 = vld [vmem:[#allocation2 + $0x60] sm:$0xff] }
  0x17   :  { %v59_v16 = vadd.f32 %v39_v13, %v38_v12  ;;  %v43_v19 = vld [vmem:[#allocation2 + $0x78] sm:$0xff]  ;;  %v41_v21 = vld [vmem:[#allocation2 + $0x68] sm:$0xff] }
  0x18   :  { %v65_v22 = vadd.f32 %v43_v19, %v42_v18  ;;  %v62_v23 = vadd.f32 %v41_v21, %v40_v20 }
  0x19   :  { %54 = vadd.xlane.f32.xlu1 %v53_v10 }
  0x1a   :  { %48 = vadd.xlane.f32.xlu0 %v47_v11 }
  0x1d   :  { %60 = vadd.xlane.f32.xlu1 %v59_v16 }
  0x1e   :  { %57 = vadd.xlane.f32.xlu0 %v56_v17 }
  0x21   :  { %66 = vadd.xlane.f32.xlu1 %v65_v22 }
  0x22   :  { %63 = vadd.xlane.f32.xlu0 %v62_v23 }
  0xa2   :  { %v52_v24 = vpop.xlane.xlu1 %51 }
  0xa3   :  { %75 = vst.msk [vmem:[%s200_s1 + $0x10] sm:$0xff] %vm72_vm0, %v52_v24  ;;  %v46_v25 = vpop.xlane.xlu0 %45 }
  0xa4   :  { %73 = vst.msk [vmem:[%s200_s1] sm:$0xff] %vm72_vm0, %v46_v25 }
  0xa6   :  { %v55_v26 = vpop.xlane.xlu1 %54 }
  0xa7   :  { %76 = vst.msk [vmem:[%s200_s1 + $0x18] sm:$0xff] %vm72_vm0, %v55_v26  ;;  %v49_v27 = vpop.xlane.xlu0 %48 }
  0xa8   :  { %74 = vst.msk [vmem:[%s200_s1 + $0x8] sm:$0xff] %vm72_vm0, %v49_v27 }
  0xaa   :  { %v61_v28 = vpop.xlane.xlu1 %60 }
  0xab   :  { %78 = vst.msk [vmem:[%s200_s1 + $0x28] sm:$0xff] %vm72_vm0, %v61_v28  ;;  %v58_v29 = vpop.xlane.xlu0 %57 }
  0xac   :  { %77 = vst.msk [vmem:[%s200_s1 + $0x20] sm:$0xff] %vm72_vm0, %v58_v29 }
  0xae   :  { %v67_v30 = vpop.xlane.xlu1 %66 }
  0xaf   :  { %80 = vst.msk [vmem:[%s200_s1 + $0x38] sm:$0xff] %vm72_vm0, %v67_v30  ;;  %v64_v31 = vpop.xlane.xlu0 %63 }
  0xb0   :  { %79 = vst.msk [vmem:[%s200_s1 + $0x30] sm:$0xff] %vm72_vm0, %v64_v31 }
  0xb1   :  { %114 = vsyncpa [#allocation3], 1 }

</bundles_post_ra>
